<compile_context>
chip_gen: v7x
topology: tpu7x:2x2x1
jax: 0.10.0
libtpu: 0.0.40
codegen_flags: <defaults>
</compile_context>

<pallas_src>
import jax
import jax.numpy as jnp
from jax.experimental import pallas as pl
from jax.experimental.pallas import tpu as pltpu


# ----------------------------------------------------------------------------
# Kernel
# ----------------------------------------------------------------------------
def _quad12d_kernel(dt_ref, s_ref, u_ref, o_ref):
    """Euler step on one SoA tile.

    dt_ref: (1,) f32 in SMEM
    s_ref : (12, Rb, 128) f32 in VMEM
    u_ref : ( 4, Rb, 128) f32 in VMEM
    o_ref : (12, Rb, 128) f32 in VMEM
    """
    dt = dt_ref[0]

    # Physical constants (folded at trace time).
    g = -9.81
    K = 5.0                      # m = 1  ->  K / m == K
    Ix, Iy, Iz = 0.5, 0.1, 0.3
    inv_Ix, inv_Iy, inv_Iz = 1.0 / Ix, 1.0 / Iy, 1.0 / Iz

    # Component tiles, each a dense (Rb, 128) f32 array (full vreg occupancy).
    x = s_ref[0]
    y = s_ref[1]
    z = s_ref[2]
    phi = s_ref[3]
    theta = s_ref[4]
    psi = s_ref[5]
    x_dot = s_ref[6]
    y_dot = s_ref[7]
    z_dot = s_ref[8]
    p = s_ref[9]
    q = s_ref[10]
    r = s_ref[11]

    u1 = u_ref[0]
    u2 = u_ref[1]
    u3 = u_ref[2]
    u4 = u_ref[3]

    cphi = jnp.cos(phi)
    sphi = jnp.sin(phi)
    ctheta = jnp.cos(theta)
    stheta = jnp.sin(theta)
    cpsi = jnp.cos(psi)
    spsi = jnp.sin(psi)

    inv_ctheta = 1.0 / ctheta            # exact reciprocal, reused 2x
    ttheta = stheta * inv_ctheta         # tan(theta) without a 2nd transcendental

    Ku1 = K * u1
    x_ddot = -(sphi * spsi + cpsi * cphi * stheta) * Ku1
    y_ddot = -(cpsi * sphi - cphi * spsi * stheta) * Ku1
    z_ddot = g - cphi * ctheta * Ku1

    p_dot = ((Iy - Iz) * (q * r) + K * u2) * inv_Ix
    q_dot = ((Iz - Ix) * (p * r) + K * u3) * inv_Iy
    r_dot = ((Ix - Iy) * (p * q) + K * u4) * inv_Iz

    t_qr = q * sphi + r * cphi           # shared by psi_dot and phi_dot
    psi_dot = t_qr * inv_ctheta
    theta_dot = q * cphi - r * sphi
    phi_dot = p + t_qr * ttheta

    # Per-row lane-dense stores (no concat / cross-sublane shuffles).
    o_ref[0] = x + x_dot * dt
    o_ref[1] = y + y_dot * dt
    o_ref[2] = z + z_dot * dt
    o_ref[3] = phi + phi_dot * dt
    o_ref[4] = theta + theta_dot * dt
    o_ref[5] = psi + psi_dot * dt
    o_ref[6] = x_dot + x_ddot * dt
    o_ref[7] = y_dot + y_ddot * dt
    o_ref[8] = z_dot + z_ddot * dt
    o_ref[9] = p + p_dot * dt
    o_ref[10] = q + q_dot * dt
    o_ref[11] = r + r_dot * dt


# ----------------------------------------------------------------------------
# pallas_call wrappers
# ----------------------------------------------------------------------------
_LANES = 128


def _quad12d_step_soa(s_soa, u_soa, dt_arr, block_rows):
    """Core call on SoA arrays: s_soa (12, R, 128), u_soa (4, R, 128)."""
    _, r_total, lanes = s_soa.shape
    grid = (r_total // block_rows,)
    return pl.pallas_call(
        _quad12d_kernel,
        out_shape=jax.ShapeDtypeStruct((12, r_total, lanes), jnp.float32),
        grid_spec=pltpu.PrefetchScalarGridSpec(
            num_scalar_prefetch=0,
            grid=grid,
            in_specs=[
                # dt scalar lives in SMEM -> no recompile per distinct dt.
                pl.BlockSpec(memory_space=pltpu.MemorySpace.SMEM),
                pl.BlockSpec((12, block_rows, lanes), lambda i: (0, i, 0)),
                pl.BlockSpec((4, block_rows, lanes), lambda i: (0, i, 0)),
            ],
            out_specs=pl.BlockSpec((12, block_rows, lanes),
                                   lambda i: (0, i, 0)),
        ),
        compiler_params=pltpu.CompilerParams(
            dimension_semantics=("parallel",),
            # (12+4+12) comps * Rb * 128 * 4B, double-buffered: well under this
            # even at Rb=128; leave the default headroom explicit.
            vmem_limit_bytes=32 * 1024 * 1024,
        ),
    )(dt_arr, s_soa, u_soa)


def _choose_block_rows(rows_needed, max_block_rows=128, target_grid=4):
    """Prefer large blocks (per-step overhead ~0.35us dominates a mem-bound
    elementwise kernel), but keep >= target_grid steps when there is enough
    work so the 'parallel' grid axis can shard across both v7x TensorCores."""
    rb = -(-rows_needed // target_grid)          # ceil
    rb = ((rb + 7) // 8) * 8                     # multiple of 8 sublanes (f32)
    return max(8, min(max_block_rows, rb))


def quadcopter12d_step(state, control, dt, *, max_block_rows=128,
                       target_grid=4, min_pallas_batch=2048,
                       force_pallas=False):
    """Pallas wrapper matching Quadcopter12DDynamics.forward semantics.

    state: (..., 12), control: (..., 4)  ->  (..., 12) float32.
    """
    assert state.shape[-1] == 12 and control.shape[-1] == 4
    batch_shape = state.shape[:-1]

    s2 = jnp.asarray(state, jnp.float32).reshape(-1, 12)
    u2 = jnp.asarray(control, jnp.float32).reshape(-1, 4)
    B = s2.shape[0]

    if not force_pallas and B < min_pallas_batch:
        # Launch + padding + layout cost dominates tiny batches; XLA fuses the
        # reference into a handful of vector ops, so just use it.
        return _reference_step(jnp.asarray(state, jnp.float32),
                               jnp.asarray(control, jnp.float32), dt)

    rows_needed = -(-B // _LANES)                        # ceil(B / 128)
    rb = _choose_block_rows(rows_needed, max_block_rows, target_grid)
    r_total = -(-rows_needed // rb) * rb
    Bp = r_total * _LANES

    if Bp != B:
        s2 = jnp.pad(s2, ((0, Bp - B), (0, 0)))
        u2 = jnp.pad(u2, ((0, Bp - B), (0, 0)))

    # AoS (Bp, C) -> SoA (C, r_total, 128): one transpose + free reshape.
    # TODO(synk): for peak HBM efficiency keep state/control in this SoA layout
    # end-to-end (call _quad12d_step_soa directly) instead of paying the
    # transpose passes around the custom call.
    s_soa = s2.T.reshape(12, r_total, _LANES)
    u_soa = u2.T.reshape(4, r_total, _LANES)
    dt_arr = jnp.asarray(dt, jnp.float32).reshape(1)

    out_soa = _quad12d_step_soa(s_soa, u_soa, dt_arr, rb)

    out = out_soa.reshape(12, Bp).T[:B]
    return out.reshape(*batch_shape, 12)


# ----------------------------------------------------------------------------
# Pure-JAX reference (mirrors the PyTorch forward exactly)
# ----------------------------------------------------------------------------
def _reference_step(state, control, dt):
    g = -9.81
    m = 1.0
    Ix, Iy, Iz = 0.5, 0.1, 0.3
    K = 5.0
    (x, y, z, phi, theta, psi,
     x_dot, y_dot, z_dot, p, q, r) = jnp.split(state, 12, axis=-1)
    u1, u2, u3, u4 = jnp.split(control, 4, axis=-1)
    cphi, ctheta, cpsi = jnp.cos(phi), jnp.cos(theta), jnp.cos(psi)
    sphi, stheta, spsi = jnp.sin(phi), jnp.sin(theta), jnp.sin(psi)
    ttheta = jnp.tan(theta)
    x_ddot = -(sphi * spsi + cpsi * cphi * stheta) * K * u1 / m
    y_ddot = -(cpsi * sphi - cphi * spsi * stheta) * K * u1 / m
    z_ddot = g - cphi * ctheta * K * u1 / m
    p_dot = ((Iy - Iz) * q * r + K * u2) / Ix
    q_dot = ((Iz - Ix) * p * r + K * u3) / Iy
    r_dot = ((Ix - Iy) * p * q + K * u4) / Iz
    psi_dot = q * sphi / ctheta + r * cphi / ctheta
    theta_dot = q * cphi - r * sphi
    phi_dot = p + q * sphi * ttheta + r * cphi * ttheta
    dstate = jnp.concatenate(
        (x_dot, y_dot, z_dot, phi_dot, theta_dot, psi_dot,
         x_ddot, y_ddot, z_ddot, p_dot, q_dot, r_dot), axis=-1)
    return state + dstate * dt


if __name__ == "__main__":
    key = jax.random.PRNGKey(0)
    k1, k2, k3, k4 = jax.random.split(key, 4)
    dt = 0.05

    # 1) Small shapes matching the module's typical use; force the Pallas path.
    B, N = 2, 8
    state = 0.1 * jax.random.normal(k1, (B, N, 12), dtype=jnp.float32)
    control = 0.1 * jax.random.normal(k2, (B, N, 4), dtype=jnp.float32)
    out = quadcopter12d_step(state, control, dt, force_pallas=True)
    out = jax.block_until_ready(out)
    ref = _reference_step(state, control, dt)
    assert out.shape == (B, N, 12)
    assert jnp.allclose(out, ref, atol=1e-5, rtol=1e-5), (
        float(jnp.max(jnp.abs(out - ref))))

    # 2) Larger batch: exercises multi-step grid + default routing.
    B2 = 8192
    state2 = 0.1 * jax.random.normal(k3, (B2, 12), dtype=jnp.float32)
    control2 = 0.1 * jax.random.normal(k4, (B2, 4), dtype=jnp.float32)
    out2 = quadcopter12d_step(state2, control2, dt)
    out2 = jax.block_until_ready(out2)
    ref2 = _reference_step(state2, control2, dt)
    assert out2.shape == (B2, 12)
    assert jnp.allclose(out2, ref2, atol=1e-5, rtol=1e-5), (
        float(jnp.max(jnp.abs(out2 - ref2))))

    print("KERNEL_OK")
</pallas_src>

<mosaic_0001>
module attributes {stable_mosaic.version = 11 : i64} {
  func.func @_quad12d_kernel(%arg0: i32, %arg1: memref<1xf32, #tpu.memory_space<smem>>, %arg2: memref<12x8x128xf32, #tpu.memory_space<vmem>>, %arg3: memref<4x8x128xf32, #tpu.memory_space<vmem>>, %arg4: memref<12x8x128xf32, #tpu.memory_space<vmem>>) attributes {dimension_semantics = [#tpu.dimension_semantics<parallel>], iteration_bounds = array<i64: 1>, scalar_prefetch = 0 : i64, scratch_operands = 0 : i64, tpu.core_type = #tpu.core_type<tc>, window_params = [{transform_indices = @transform_0, window_bounds = array<i64: 1>}, {transform_indices = @transform_1, window_bounds = array<i64: 12, 8, 128>}, {transform_indices = @transform_2, window_bounds = array<i64: 4, 8, 128>}, {transform_indices = @transform_3, window_bounds = array<i64: 12, 8, 128>}]} {
    %c0 = arith.constant 0 : index
    %0 = memref.load %arg1[%c0] : memref<1xf32, #tpu.memory_space<smem>>
    %c0_0 = arith.constant 0 : index
    %c0_1 = arith.constant 0 : index
    %c0_2 = arith.constant 0 : index
    %1 = vector.load %arg2[%c0_0, %c0_1, %c0_2] : memref<12x8x128xf32, #tpu.memory_space<vmem>>, vector<1x8x128xf32>
    %2 = vector.shape_cast %1 : vector<1x8x128xf32> to vector<8x128xf32>
    %c1 = arith.constant 1 : index
    %c0_3 = arith.constant 0 : index
    %c0_4 = arith.constant 0 : index
    %3 = vector.load %arg2[%c1, %c0_3, %c0_4] : memref<12x8x128xf32, #tpu.memory_space<vmem>>, vector<1x8x128xf32>
    %4 = vector.shape_cast %3 : vector<1x8x128xf32> to vector<8x128xf32>
    %c2 = arith.constant 2 : index
    %c0_5 = arith.constant 0 : index
    %c0_6 = arith.constant 0 : index
    %5 = vector.load %arg2[%c2, %c0_5, %c0_6] : memref<12x8x128xf32, #tpu.memory_space<vmem>>, vector<1x8x128xf32>
    %6 = vector.shape_cast %5 : vector<1x8x128xf32> to vector<8x128xf32>
    %c3 = arith.constant 3 : index
    %c0_7 = arith.constant 0 : index
    %c0_8 = arith.constant 0 : index
    %7 = vector.load %arg2[%c3, %c0_7, %c0_8] : memref<12x8x128xf32, #tpu.memory_space<vmem>>, vector<1x8x128xf32>
    %8 = vector.shape_cast %7 : vector<1x8x128xf32> to vector<8x128xf32>
    %c4 = arith.constant 4 : index
    %c0_9 = arith.constant 0 : index
    %c0_10 = arith.constant 0 : index
    %9 = vector.load %arg2[%c4, %c0_9, %c0_10] : memref<12x8x128xf32, #tpu.memory_space<vmem>>, vector<1x8x128xf32>
    %10 = vector.shape_cast %9 : vector<1x8x128xf32> to vector<8x128xf32>
    %c5 = arith.constant 5 : index
    %c0_11 = arith.constant 0 : index
    %c0_12 = arith.constant 0 : index
    %11 = vector.load %arg2[%c5, %c0_11, %c0_12] : memref<12x8x128xf32, #tpu.memory_space<vmem>>, vector<1x8x128xf32>
    %12 = vector.shape_cast %11 : vector<1x8x128xf32> to vector<8x128xf32>
    %c6 = arith.constant 6 : index
    %c0_13 = arith.constant 0 : index
    %c0_14 = arith.constant 0 : index
    %13 = vector.load %arg2[%c6, %c0_13, %c0_14] : memref<12x8x128xf32, #tpu.memory_space<vmem>>, vector<1x8x128xf32>
    %14 = vector.shape_cast %13 : vector<1x8x128xf32> to vector<8x128xf32>
    %c7 = arith.constant 7 : index
    %c0_15 = arith.constant 0 : index
    %c0_16 = arith.constant 0 : index
    %15 = vector.load %arg2[%c7, %c0_15, %c0_16] : memref<12x8x128xf32, #tpu.memory_space<vmem>>, vector<1x8x128xf32>
    %16 = vector.shape_cast %15 : vector<1x8x128xf32> to vector<8x128xf32>
    %c8 = arith.constant 8 : index
    %c0_17 = arith.constant 0 : index
    %c0_18 = arith.constant 0 : index
    %17 = vector.load %arg2[%c8, %c0_17, %c0_18] : memref<12x8x128xf32, #tpu.memory_space<vmem>>, vector<1x8x128xf32>
    %18 = vector.shape_cast %17 : vector<1x8x128xf32> to vector<8x128xf32>
    %c9 = arith.constant 9 : index
    %c0_19 = arith.constant 0 : index
    %c0_20 = arith.constant 0 : index
    %19 = vector.load %arg2[%c9, %c0_19, %c0_20] : memref<12x8x128xf32, #tpu.memory_space<vmem>>, vector<1x8x128xf32>
    %20 = vector.shape_cast %19 : vector<1x8x128xf32> to vector<8x128xf32>
    %c10 = arith.constant 10 : index
    %c0_21 = arith.constant 0 : index
    %c0_22 = arith.constant 0 : index
    %21 = vector.load %arg2[%c10, %c0_21, %c0_22] : memref<12x8x128xf32, #tpu.memory_space<vmem>>, vector<1x8x128xf32>
    %22 = vector.shape_cast %21 : vector<1x8x128xf32> to vector<8x128xf32>
    %c11 = arith.constant 11 : index
    %c0_23 = arith.constant 0 : index
    %c0_24 = arith.constant 0 : index
    %23 = vector.load %arg2[%c11, %c0_23, %c0_24] : memref<12x8x128xf32, #tpu.memory_space<vmem>>, vector<1x8x128xf32>
    %24 = vector.shape_cast %23 : vector<1x8x128xf32> to vector<8x128xf32>
    %c0_25 = arith.constant 0 : index
    %c0_26 = arith.constant 0 : index
    %c0_27 = arith.constant 0 : index
    %25 = vector.load %arg3[%c0_25, %c0_26, %c0_27] : memref<4x8x128xf32, #tpu.memory_space<vmem>>, vector<1x8x128xf32>
    %26 = vector.shape_cast %25 : vector<1x8x128xf32> to vector<8x128xf32>
    %c1_28 = arith.constant 1 : index
    %c0_29 = arith.constant 0 : index
    %c0_30 = arith.constant 0 : index
    %27 = vector.load %arg3[%c1_28, %c0_29, %c0_30] : memref<4x8x128xf32, #tpu.memory_space<vmem>>, vector<1x8x128xf32>
    %28 = vector.shape_cast %27 : vector<1x8x128xf32> to vector<8x128xf32>
    %c2_31 = arith.constant 2 : index
    %c0_32 = arith.constant 0 : index
    %c0_33 = arith.constant 0 : index
    %29 = vector.load %arg3[%c2_31, %c0_32, %c0_33] : memref<4x8x128xf32, #tpu.memory_space<vmem>>, vector<1x8x128xf32>
    %30 = vector.shape_cast %29 : vector<1x8x128xf32> to vector<8x128xf32>
    %c3_34 = arith.constant 3 : index
    %c0_35 = arith.constant 0 : index
    %c0_36 = arith.constant 0 : index
    %31 = vector.load %arg3[%c3_34, %c0_35, %c0_36] : memref<4x8x128xf32, #tpu.memory_space<vmem>>, vector<1x8x128xf32>
    %32 = vector.shape_cast %31 : vector<1x8x128xf32> to vector<8x128xf32>
    %33 = math.cos %8 : vector<8x128xf32>
    %34 = math.sin %8 : vector<8x128xf32>
    %35 = math.cos %10 : vector<8x128xf32>
    %36 = math.sin %10 : vector<8x128xf32>
    %37 = math.cos %12 : vector<8x128xf32>
    %38 = math.sin %12 : vector<8x128xf32>
    %cst = arith.constant 1.000000e+00 : f32
    %39 = vector.broadcast %cst : f32 to vector<8x128xf32>
    %40 = arith.divf %39, %35 : vector<8x128xf32>
    %41 = arith.mulf %36, %40 : vector<8x128xf32>
    %cst_37 = arith.constant 5.000000e+00 : f32
    %42 = vector.broadcast %cst_37 : f32 to vector<8x128xf32>
    %43 = arith.mulf %42, %26 : vector<8x128xf32>
    %44 = arith.mulf %34, %38 : vector<8x128xf32>
    %45 = arith.mulf %37, %33 : vector<8x128xf32>
    %46 = arith.mulf %45, %36 : vector<8x128xf32>
    %47 = arith.addf %44, %46 : vector<8x128xf32>
    %cst_38 = arith.constant 0.000000e+00 : f32
    %48 = vector.broadcast %cst_38 : f32 to vector<8x128xf32>
    %49 = arith.subf %48, %47 : vector<8x128xf32>
    %50 = arith.mulf %49, %43 : vector<8x128xf32>
    %51 = arith.mulf %37, %34 : vector<8x128xf32>
    %52 = arith.mulf %33, %38 : vector<8x128xf32>
    %53 = arith.mulf %52, %36 : vector<8x128xf32>
    %54 = arith.subf %51, %53 : vector<8x128xf32>
    %cst_39 = arith.constant 0.000000e+00 : f32
    %55 = vector.broadcast %cst_39 : f32 to vector<8x128xf32>
    %56 = arith.subf %55, %54 : vector<8x128xf32>
    %57 = arith.mulf %56, %43 : vector<8x128xf32>
    %58 = arith.mulf %33, %35 : vector<8x128xf32>
    %59 = arith.mulf %58, %43 : vector<8x128xf32>
    %cst_40 = arith.constant -9.810000e+00 : f32
    %60 = vector.broadcast %cst_40 : f32 to vector<8x128xf32>
    %61 = arith.subf %60, %59 : vector<8x128xf32>
    %62 = arith.mulf %22, %24 : vector<8x128xf32>
    %cst_41 = arith.constant -2.000000e-01 : f32
    %63 = vector.broadcast %cst_41 : f32 to vector<8x128xf32>
    %64 = arith.mulf %63, %62 : vector<8x128xf32>
    %cst_42 = arith.constant 5.000000e+00 : f32
    %65 = vector.broadcast %cst_42 : f32 to vector<8x128xf32>
    %66 = arith.mulf %65, %28 : vector<8x128xf32>
    %67 = arith.addf %64, %66 : vector<8x128xf32>
    %cst_43 = arith.constant 2.000000e+00 : f32
    %68 = vector.broadcast %cst_43 : f32 to vector<8x128xf32>
    %69 = arith.mulf %67, %68 : vector<8x128xf32>
    %70 = arith.mulf %20, %24 : vector<8x128xf32>
    %cst_44 = arith.constant -2.000000e-01 : f32
    %71 = vector.broadcast %cst_44 : f32 to vector<8x128xf32>
    %72 = arith.mulf %71, %70 : vector<8x128xf32>
    %cst_45 = arith.constant 5.000000e+00 : f32
    %73 = vector.broadcast %cst_45 : f32 to vector<8x128xf32>
    %74 = arith.mulf %73, %30 : vector<8x128xf32>
    %75 = arith.addf %72, %74 : vector<8x128xf32>
    %cst_46 = arith.constant 1.000000e+01 : f32
    %76 = vector.broadcast %cst_46 : f32 to vector<8x128xf32>
    %77 = arith.mulf %75, %76 : vector<8x128xf32>
    %78 = arith.mulf %20, %22 : vector<8x128xf32>
    %cst_47 = arith.constant 4.000000e-01 : f32
    %79 = vector.broadcast %cst_47 : f32 to vector<8x128xf32>
    %80 = arith.mulf %79, %78 : vector<8x128xf32>
    %cst_48 = arith.constant 5.000000e+00 : f32
    %81 = vector.broadcast %cst_48 : f32 to vector<8x128xf32>
    %82 = arith.mulf %81, %32 : vector<8x128xf32>
    %83 = arith.addf %80, %82 : vector<8x128xf32>
    %cst_49 = arith.constant 3.33333325 : f32
    %84 = vector.broadcast %cst_49 : f32 to vector<8x128xf32>
    %85 = arith.mulf %83, %84 : vector<8x128xf32>
    %86 = arith.mulf %22, %34 : vector<8x128xf32>
    %87 = arith.mulf %24, %33 : vector<8x128xf32>
    %88 = arith.addf %86, %87 : vector<8x128xf32>
    %89 = arith.mulf %88, %40 : vector<8x128xf32>
    %90 = arith.mulf %22, %33 : vector<8x128xf32>
    %91 = arith.mulf %24, %34 : vector<8x128xf32>
    %92 = arith.subf %90, %91 : vector<8x128xf32>
    %93 = arith.mulf %88, %41 : vector<8x128xf32>
    %94 = arith.addf %20, %93 : vector<8x128xf32>
    %95 = vector.broadcast %0 : f32 to vector<8x128xf32>
    %96 = arith.mulf %14, %95 : vector<8x128xf32>
    %97 = arith.addf %2, %96 : vector<8x128xf32>
    %c0_50 = arith.constant 0 : index
    %c0_51 = arith.constant 0 : index
    %c0_52 = arith.constant 0 : index
    %98 = vector.load %arg4[%c0_50, %c0_51, %c0_52] : memref<12x8x128xf32, #tpu.memory_space<vmem>>, vector<1x8x128xf32>
    %99 = vector.shape_cast %98 : vector<1x8x128xf32> to vector<8x128xf32>
    %100 = vector.shape_cast %97 : vector<8x128xf32> to vector<1x8x128xf32>
    tpu.vector_store %arg4[%c0_50, %c0_51, %c0_52], %100 {strides = array<i32>} : memref<12x8x128xf32, #tpu.memory_space<vmem>>, vector<1x8x128xf32>,
    %101 = vector.broadcast %0 : f32 to vector<8x128xf32>
    %102 = arith.mulf %16, %101 : vector<8x128xf32>
    %103 = arith.addf %4, %102 : vector<8x128xf32>
    %c1_53 = arith.constant 1 : index
    %c0_54 = arith.constant 0 : index
    %c0_55 = arith.constant 0 : index
    %104 = vector.load %arg4[%c1_53, %c0_54, %c0_55] : memref<12x8x128xf32, #tpu.memory_space<vmem>>, vector<1x8x128xf32>
    %105 = vector.shape_cast %104 : vector<1x8x128xf32> to vector<8x128xf32>
    %106 = vector.shape_cast %103 : vector<8x128xf32> to vector<1x8x128xf32>
    tpu.vector_store %arg4[%c1_53, %c0_54, %c0_55], %106 {strides = array<i32>} : memref<12x8x128xf32, #tpu.memory_space<vmem>>, vector<1x8x128xf32>,
    %107 = vector.broadcast %0 : f32 to vector<8x128xf32>
    %108 = arith.mulf %18, %107 : vector<8x128xf32>
    %109 = arith.addf %6, %108 : vector<8x128xf32>
    %c2_56 = arith.constant 2 : index
    %c0_57 = arith.constant 0 : index
    %c0_58 = arith.constant 0 : index
    %110 = vector.load %arg4[%c2_56, %c0_57, %c0_58] : memref<12x8x128xf32, #tpu.memory_space<vmem>>, vector<1x8x128xf32>
    %111 = vector.shape_cast %110 : vector<1x8x128xf32> to vector<8x128xf32>
    %112 = vector.shape_cast %109 : vector<8x128xf32> to vector<1x8x128xf32>
    tpu.vector_store %arg4[%c2_56, %c0_57, %c0_58], %112 {strides = array<i32>} : memref<12x8x128xf32, #tpu.memory_space<vmem>>, vector<1x8x128xf32>,
    %113 = vector.broadcast %0 : f32 to vector<8x128xf32>
    %114 = arith.mulf %94, %113 : vector<8x128xf32>
    %115 = arith.addf %8, %114 : vector<8x128xf32>
    %c3_59 = arith.constant 3 : index
    %c0_60 = arith.constant 0 : index
    %c0_61 = arith.constant 0 : index
    %116 = vector.load %arg4[%c3_59, %c0_60, %c0_61] : memref<12x8x128xf32, #tpu.memory_space<vmem>>, vector<1x8x128xf32>
    %117 = vector.shape_cast %116 : vector<1x8x128xf32> to vector<8x128xf32>
    %118 = vector.shape_cast %115 : vector<8x128xf32> to vector<1x8x128xf32>
    tpu.vector_store %arg4[%c3_59, %c0_60, %c0_61], %118 {strides = array<i32>} : memref<12x8x128xf32, #tpu.memory_space<vmem>>, vector<1x8x128xf32>,
    %119 = vector.broadcast %0 : f32 to vector<8x128xf32>
    %120 = arith.mulf %92, %119 : vector<8x128xf32>
    %121 = arith.addf %10, %120 : vector<8x128xf32>
    %c4_62 = arith.constant 4 : index
    %c0_63 = arith.constant 0 : index
    %c0_64 = arith.constant 0 : index
    %122 = vector.load %arg4[%c4_62, %c0_63, %c0_64] : memref<12x8x128xf32, #tpu.memory_space<vmem>>, vector<1x8x128xf32>
    %123 = vector.shape_cast %122 : vector<1x8x128xf32> to vector<8x128xf32>
    %124 = vector.shape_cast %121 : vector<8x128xf32> to vector<1x8x128xf32>
    tpu.vector_store %arg4[%c4_62, %c0_63, %c0_64], %124 {strides = array<i32>} : memref<12x8x128xf32, #tpu.memory_space<vmem>>, vector<1x8x128xf32>,
    %125 = vector.broadcast %0 : f32 to vector<8x128xf32>
    %126 = arith.mulf %89, %125 : vector<8x128xf32>
    %127 = arith.addf %12, %126 : vector<8x128xf32>
    %c5_65 = arith.constant 5 : index
    %c0_66 = arith.constant 0 : index
    %c0_67 = arith.constant 0 : index
    %128 = vector.load %arg4[%c5_65, %c0_66, %c0_67] : memref<12x8x128xf32, #tpu.memory_space<vmem>>, vector<1x8x128xf32>
    %129 = vector.shape_cast %128 : vector<1x8x128xf32> to vector<8x128xf32>
    %130 = vector.shape_cast %127 : vector<8x128xf32> to vector<1x8x128xf32>
    tpu.vector_store %arg4[%c5_65, %c0_66, %c0_67], %130 {strides = array<i32>} : memref<12x8x128xf32, #tpu.memory_space<vmem>>, vector<1x8x128xf32>,
    %131 = vector.broadcast %0 : f32 to vector<8x128xf32>
    %132 = arith.mulf %50, %131 : vector<8x128xf32>
    %133 = arith.addf %14, %132 : vector<8x128xf32>
    %c6_68 = arith.constant 6 : index
    %c0_69 = arith.constant 0 : index
    %c0_70 = arith.constant 0 : index
    %134 = vector.load %arg4[%c6_68, %c0_69, %c0_70] : memref<12x8x128xf32, #tpu.memory_space<vmem>>, vector<1x8x128xf32>
    %135 = vector.shape_cast %134 : vector<1x8x128xf32> to vector<8x128xf32>
    %136 = vector.shape_cast %133 : vector<8x128xf32> to vector<1x8x128xf32>
    tpu.vector_store %arg4[%c6_68, %c0_69, %c0_70], %136 {strides = array<i32>} : memref<12x8x128xf32, #tpu.memory_space<vmem>>, vector<1x8x128xf32>,
    %137 = vector.broadcast %0 : f32 to vector<8x128xf32>
    %138 = arith.mulf %57, %137 : vector<8x128xf32>
    %139 = arith.addf %16, %138 : vector<8x128xf32>
    %c7_71 = arith.constant 7 : index
    %c0_72 = arith.constant 0 : index
    %c0_73 = arith.constant 0 : index
    %140 = vector.load %arg4[%c7_71, %c0_72, %c0_73] : memref<12x8x128xf32, #tpu.memory_space<vmem>>, vector<1x8x128xf32>
    %141 = vector.shape_cast %140 : vector<1x8x128xf32> to vector<8x128xf32>
    %142 = vector.shape_cast %139 : vector<8x128xf32> to vector<1x8x128xf32>
    tpu.vector_store %arg4[%c7_71, %c0_72, %c0_73], %142 {strides = array<i32>} : memref<12x8x128xf32, #tpu.memory_space<vmem>>, vector<1x8x128xf32>,
    %143 = vector.broadcast %0 : f32 to vector<8x128xf32>
    %144 = arith.mulf %61, %143 : vector<8x128xf32>
    %145 = arith.addf %18, %144 : vector<8x128xf32>
    %c8_74 = arith.constant 8 : index
    %c0_75 = arith.constant 0 : index
    %c0_76 = arith.constant 0 : index
    %146 = vector.load %arg4[%c8_74, %c0_75, %c0_76] : memref<12x8x128xf32, #tpu.memory_space<vmem>>, vector<1x8x128xf32>
    %147 = vector.shape_cast %146 : vector<1x8x128xf32> to vector<8x128xf32>
    %148 = vector.shape_cast %145 : vector<8x128xf32> to vector<1x8x128xf32>
    tpu.vector_store %arg4[%c8_74, %c0_75, %c0_76], %148 {strides = array<i32>} : memref<12x8x128xf32, #tpu.memory_space<vmem>>, vector<1x8x128xf32>,
    %149 = vector.broadcast %0 : f32 to vector<8x128xf32>
    %150 = arith.mulf %69, %149 : vector<8x128xf32>
    %151 = arith.addf %20, %150 : vector<8x128xf32>
    %c9_77 = arith.constant 9 : index
    %c0_78 = arith.constant 0 : index
    %c0_79 = arith.constant 0 : index
    %152 = vector.load %arg4[%c9_77, %c0_78, %c0_79] : memref<12x8x128xf32, #tpu.memory_space<vmem>>, vector<1x8x128xf32>
    %153 = vector.shape_cast %152 : vector<1x8x128xf32> to vector<8x128xf32>
    %154 = vector.shape_cast %151 : vector<8x128xf32> to vector<1x8x128xf32>
    tpu.vector_store %arg4[%c9_77, %c0_78, %c0_79], %154 {strides = array<i32>} : memref<12x8x128xf32, #tpu.memory_space<vmem>>, vector<1x8x128xf32>,
    %155 = vector.broadcast %0 : f32 to vector<8x128xf32>
    %156 = arith.mulf %77, %155 : vector<8x128xf32>
    %157 = arith.addf %22, %156 : vector<8x128xf32>
    %c10_80 = arith.constant 10 : index
    %c0_81 = arith.constant 0 : index
    %c0_82 = arith.constant 0 : index
    %158 = vector.load %arg4[%c10_80, %c0_81, %c0_82] : memref<12x8x128xf32, #tpu.memory_space<vmem>>, vector<1x8x128xf32>
    %159 = vector.shape_cast %158 : vector<1x8x128xf32> to vector<8x128xf32>
    %160 = vector.shape_cast %157 : vector<8x128xf32> to vector<1x8x128xf32>
    tpu.vector_store %arg4[%c10_80, %c0_81, %c0_82], %160 {strides = array<i32>} : memref<12x8x128xf32, #tpu.memory_space<vmem>>, vector<1x8x128xf32>,
    %161 = vector.broadcast %0 : f32 to vector<8x128xf32>
    %162 = arith.mulf %85, %161 : vector<8x128xf32>
    %163 = arith.addf %24, %162 : vector<8x128xf32>
    %c11_83 = arith.constant 11 : index
    %c0_84 = arith.constant 0 : index
    %c0_85 = arith.constant 0 : index
    %164 = vector.load %arg4[%c11_83, %c0_84, %c0_85] : memref<12x8x128xf32, #tpu.memory_space<vmem>>, vector<1x8x128xf32>
    %165 = vector.shape_cast %164 : vector<1x8x128xf32> to vector<8x128xf32>
    %166 = vector.shape_cast %163 : vector<8x128xf32> to vector<1x8x128xf32>
    tpu.vector_store %arg4[%c11_83, %c0_84, %c0_85], %166 {strides = array<i32>} : memref<12x8x128xf32, #tpu.memory_space<vmem>>, vector<1x8x128xf32>,
    return
  }
  func.func @transform_0(%arg0: i32) -> i32 {
    %c0_i32 = arith.constant 0 : i32
    %c0_i32_0 = arith.constant 0 : i32
    return %c0_i32 : i32
  }
  func.func @transform_1(%arg0: i32) -> (i32, i32, i32) {
    %c0_i32 = arith.constant 0 : i32
    %c0_i32_0 = arith.constant 0 : i32
    %c0_i32_1 = arith.constant 0 : i32
    return %c0_i32, %arg0, %c0_i32_0 : i32, i32, i32
  }
  func.func @transform_2(%arg0: i32) -> (i32, i32, i32) {
    %c0_i32 = arith.constant 0 : i32
    %c0_i32_0 = arith.constant 0 : i32
    %c0_i32_1 = arith.constant 0 : i32
    return %c0_i32, %arg0, %c0_i32_0 : i32, i32, i32
  }
  func.func @transform_3(%arg0: i32) -> (i32, i32, i32) {
    %c0_i32 = arith.constant 0 : i32
    %c0_i32_0 = arith.constant 0 : i32
    %c0_i32_1 = arith.constant 0 : i32
    return %c0_i32, %arg0, %c0_i32_0 : i32, i32, i32
  }
}

</mosaic_0001>

<bundles_post_ra>
// kernel: tpu_custom_call.1
= control target key start
LH: loop header
LB: loop body
LE: loop exit
PB: predicated region body
PF: predicated region fallthrough
CT: control target
= control target key end

     0   :  { %9 = vsyncpa [#allocation4], 0  ;;  %s1290_s0 = inlined_call_operand.<no memory space> [shape: f32[1], index: 0, kind: input, shape index: {}]   ;;  %s1291_s1 = inlined_call_operand.hbm [shape: f32[12,8,128], index: 1, kind: input, shape index: {}]   ;;  %s1292_s2 = inlined_call_operand.hbm [shape: f32[4,8,128], index: 2, kind: input, shape index: {}]   ;;  %s1293_s3 = inlined_call_operand.hbm [shape: f32[12,8,128], index: 3, kind: output, shape index: {}]  }
   0x1   :  { %10 = vsyncpa [#allocation7], 0 }
   0x2   :  { %11 = vsyncpa [#allocation5], 0  ;;  %s938_s12 = smov [#allocation3]   ;;  %s866_s16 = scalar_lea.hbm %s1291_s1, 1536 }
   0x3   :  { %s19_s13 = sshll.u32 %s938_s12, 4  ;;  %p867_p0 = scmp.ne.s32.totalorder %s1291_s1, %s866_s16  ;;  %s20_s13 = int_to_ptr.vmem [resolvable:$true] %s19_s13 }
   0x4   :  { %p870_p1 = scmp.lt.u32.totalorder %s866_s16, %s1291_s1 }
   0x6   :  { %p872_p2 = pnand %p870_p1, %p867_p0 }
   0x8   :  { %875 = shalt.err (!%p872_p2)
}
   0x9   :  { %s876_s21 = scalar_lea.vmem %s20_s13, 1536  ;;  %p881_p4 = scmp.lt.s32.totalorder %s20_s13, %s20_s13 }
   0xa   :  { %p877_p3 = scmp.ne.s32.totalorder %s20_s13, %s876_s21  ;;  %p882_p5 = scmp.lt.s32.totalorder %s876_s21, %s876_s21 }
   0xc   :  { %p883_p6 = por %p882_p5, %p881_p4 }
   0xe   :  { %p884_p7 = pnand %p883_p6, %p877_p3 }
  0x10   :  { %887 = shalt.err (!%p884_p7)
}
  0x11   :  { %s939_s22 = smov 128   ;;  %s940_s23 = smov 8  }
  0x12   :  { %25 = dma.hbm_to_vmem [thread:$0]  %s1291_s1, 1536, %s20_s13, [#allocation4], %s939_s22, %s939_s22, %s940_s23  }
  0x13   :  { %s941_s26 = smov [#allocation6]   ;;  %s888_s30 = scalar_lea.hbm %s1292_s2, 512 }
  0x14   :  { %s31_s27 = sshll.u32 %s941_s26, 4  ;;  %p889_p8 = scmp.ne.s32.totalorder %s1292_s2, %s888_s30  ;;  %s32_s27 = int_to_ptr.vmem [resolvable:$true] %s31_s27 }
  0x15   :  { %p892_p9 = scmp.lt.u32.totalorder %s888_s30, %s1292_s2 }
  0x17   :  { %p894_p10 = pnand %p892_p9, %p889_p8 }
  0x19   :  { %897 = shalt.err (!%p894_p10)
}
  0x1a   :  { %s898_s8 = scalar_lea.vmem %s32_s27, 512  ;;  %p903_p12 = scmp.lt.s32.totalorder %s32_s27, %s32_s27 }
  0x1b   :  { %p899_p11 = scmp.ne.s32.totalorder %s32_s27, %s898_s8  ;;  %p904_p13 = scmp.lt.s32.totalorder %s898_s8, %s898_s8 }
  0x1d   :  { %p905_p0 = por %p904_p13, %p903_p12 }
  0x1f   :  { %p906_p1 = pnand %p905_p0, %p899_p11 }
  0x21   :  { %909 = shalt.err (!%p906_p1)
}
  0x22   :  { %37 = dma.hbm_to_vmem [thread:$0]  %s1292_s2, 512, %s32_s27, [#allocation7], %s939_s22, %s939_s22, %s940_s23  }
  0x23   :  { %932 = dma.done.wait [#allocation4], 1536  }
  0x24   :  { %933 = vsyncadd [#allocation4], 4294965760 }
  0x25   :  { %934 = dma.done.wait [#allocation7], 512  }
  0x26   :  { %935 = vsyncadd [#allocation7], 4294966784  ;;  %v1002_v0 = vstv %s1290_s0  ;;  %v45_v1 = vld [vmem:[#allocation3] sm:$0xff]  ;;  %v1004_v2 = vld [vmem:[#allocation3 + $0x30] sm:$0xff]  ;;  %v942_v40 = vmov 683565275  }
  0x27   :  { %v47_v3 = vld [vmem:[#allocation3 + $0x8] sm:$0xff]  ;;  %v740_v4 = vmul.f32 %v1002_v0, %v1004_v2  ;;  %v1008_v5 = vld [vmem:[#allocation3 + $0x38] sm:$0xff]  ;;  %v49_v6 = vld [vmem:[#allocation3 + $0x10] sm:$0xff]  ;;  %v943_v42 = vmov 2475754826   ;;  %s948_s0 = smov [#allocation8]  }
  0x28   :  { %v1010_v7 = vld [vmem:[#allocation3 + $0x40] sm:$0xff]  ;;  %v743_v8 = vmul.f32 %v1002_v0, %v1008_v5  ;;  %v1016_v10 = vld [vmem:[#allocation3 + $0x18] sm:$0xff]  ;;  %v1023_v19 = vld [vmem:[#allocation3 + $0x28] sm:$0xff]  ;;  %v944_v44 = vmov 2131351028   ;;  %s792_s2 = sshll.u32 %s948_s0, 4  ;;  %s793_s2 = int_to_ptr.vmem [resolvable:$true] %s792_s2 }
  0x29   :  { %v747_v9 = vmul.f32 %v1002_v0, %v1010_v7  ;;  %v741_v11 = vadd.f32 %v740_v4, %v45_v1  ;;  %v1018_v12 = vld [vmem:[#allocation3 + $0x20] sm:$0xff]  ;;  %v75_v13 = vand.u32 2147483647, %v1016_v10  ;;  %v78_v14 = vand.u32 2139095040, %v1016_v10  ;;  %s910_s12 = scalar_lea.vmem %s793_s2, 1536  ;;  %p915_p3 = scmp.lt.s32.totalorder %s793_s2, %s793_s2 }
  0x2a   :  { %v744_v15 = vadd.f32 %v743_v8, %v47_v3  ;;  %v282_v17 = vand.u32 2147483647, %v1018_v12  ;;  %v285_v21 = vand.u32 2139095040, %v1018_v12  ;;  %v492_v25 = vand.u32 2139095040, %v1023_v19  ;;  %p911_p2 = scmp.ne.s32.totalorder %s793_s2, %s910_s12  ;;  %p916_p4 = scmp.lt.s32.totalorder %s910_s12, %s910_s12 }
  0x2b   :  { %v748_v16 = vadd.f32 %v747_v9, %v49_v6  ;;  %742 = vst [vmem:[#allocation8] sm:$0xff] %v741_v11  ;;  %v79_v18 = vshrl.u32 %v78_v14, 23  ;;  %v82_v20 = vand.u32 8388607, %v75_v13  ;;  %v489_v35 = vand.u32 2147483647, %v1023_v19 }
  0x2c   :  { %746 = vst [vmem:[#allocation8 + $0x8] sm:$0xff] %v744_v15  ;;  %v289_v22 = vand.u32 8388607, %v282_v17  ;;  %v286_v24 = vshrl.u32 %v285_v21, 23  ;;  %v493_v30 = vshrl.u32 %v492_v25, 23  ;;  %vm77_vm13 = vcmp.lt.s32.totalorder %v1016_v10, 0  ;;  %p917_p5 = por %p916_p4, %p915_p3 }
  0x2d   :  { %750 = vst [vmem:[#allocation8 + $0x10] sm:$0xff] %v748_v16  ;;  %v805_v23 = vadd.s32 4294967169, %v79_v18  ;;  %v83_v27 = vor.u32 8388608, %v82_v20  ;;  %v945_v46 = vmov 2102212464  }
  0x2e   :  { %v813_v28 = vadd.s32 4294967169, %v286_v24  ;;  %v290_v29 = vor.u32 8388608, %v289_v22  ;;  %v1036_v38 = vadd.s32 4294967169, %v493_v30  ;;  %v946_v48 = vmov 920167782   ;;  %p918_p6 = pnand %p917_p5, %p911_p2 }
  0x2f   :  { %v85_v26 = vadd.s32 1, %v805_v23  ;;  %v1032_v36 = vshll.u32 %v83_v27, 8  ;;  %v947_v55 = vmov 1326507024  }
  0x30   :  { %v292_v32 = vadd.s32 1, %v813_v28  ;;  %v1034_v37 = vshll.u32 %v290_v29, 8 }
  0x31   :  { %vm86_vm0 = vcmp.gt.s32.totalorder %v85_v26, 0 }
  0x32   :  { %v87_v31 = vsel %vm86_vm0, %v85_v26, 0  ;;  %vm293_vm1 = vcmp.gt.s32.totalorder %v292_v32, 0 }
  0x33   :  { %v88_v33 = vshrl.u32 %v87_v31, 5  ;;  %v89_v34 = vand.u32 31, %v87_v31  ;;  %v294_v60 = vsel %vm293_vm1, %v292_v32, 0 }
  0x34   :  { %v295_v63 = vshrl.u32 %v294_v60, 5  ;;  %v296_v1 = vand.u32 31, %v294_v60 }
  0x35   :  { %v90_v39 = vsub.s32 32, %v89_v34  ;;  %v92_v41 = vshll.u32 %v942_v40, %v89_v34  ;;  %v95_v43 = vshll.u32 %v943_v42, %v89_v34  ;;  %v98_v45 = vshll.u32 %v944_v44, %v89_v34 }
  0x36   :  { %v101_v47 = vshll.u32 %v945_v46, %v89_v34  ;;  %v104_v49 = vshll.u32 %v946_v48, %v89_v34  ;;  %vm107_vm2 = vcmp.lt.s32.totalorder %v88_v33, 1  ;;  %vm108_vm3 = vcmp.lt.s32.totalorder %v88_v33, 2 }
  0x37   :  { %v91_v50 = vshrl.u32 %v942_v40, %v90_v39  ;;  %v93_v51 = vshrl.u32 %v943_v42, %v90_v39  ;;  %v96_v52 = vshrl.u32 %v944_v44, %v90_v39  ;;  %v99_v53 = vshrl.u32 %v945_v46, %v90_v39 }
  0x38   :  { %v102_v54 = vshrl.u32 %v946_v48, %v90_v39  ;;  %v105_v56 = vshrl.u32 %v947_v55, %v90_v39  ;;  %vm109_vm4 = vcmp.lt.s32.totalorder %v88_v33, 3  ;;  %vm110_vm5 = vcmp.lt.s32.totalorder %v88_v33, 4 }
  0x39   :  { %v94_v57 = vor.u32 %v93_v51, %v92_v41  ;;  %v97_v58 = vor.u32 %v96_v52, %v95_v43  ;;  %v100_v59 = vor.u32 %v99_v53, %v98_v45  ;;  %v297_v15 = vsub.s32 32, %v296_v1 }
  0x3a   :  { %v103_v61 = vor.u32 %v102_v54, %v101_v47  ;;  %v106_v62 = vor.u32 %v105_v56, %v104_v49  ;;  %v299_v21 = vshll.u32 %v942_v40, %v296_v1  ;;  %v302_v31 = vshll.u32 %v943_v42, %v296_v1 }
  0x3b   :  { %v111_v3 = vsel %vm107_vm2, %v91_v50, %v94_v57  ;;  %v112_v4 = vsel %vm110_vm5, %v100_v59, 2102212464  ;;  %v115_v6 = vsel %vm107_vm2, %v94_v57, %v97_v58  ;;  %v119_v8 = vsel %vm107_vm2, %v97_v58, %v100_v59 }
  0x3c   :  { %v113_v9 = vsel %vm109_vm4, %v97_v58, %v112_v4  ;;  %v116_v11 = vsel %vm110_vm5, %v103_v61, 920167782  ;;  %v120_v14 = vsel %vm110_vm5, %v106_v62, 1326507024  ;;  %v298_v25 = vshrl.u32 %v942_v40, %v297_v15 }
  0x3d   :  { %v114_v16 = vsel %vm108_vm3, %v111_v3, %v113_v9  ;;  %v117_v18 = vsel %vm109_vm4, %v100_v59, %v116_v11  ;;  %v121_v20 = vsel %vm109_vm4, %v103_v61, %v120_v14  ;;  %v300_v30 = vshrl.u32 %v943_v42, %v297_v15 }
  0x3e   :  { %v118_v22 = vsel %vm108_vm3, %v115_v6, %v117_v18  ;;  %v122_v23 = vsel %vm108_vm3, %v119_v8, %v121_v20  ;;  %v130_v24 = vmul.u32 %v1032_v36, %v114_v16  ;;  %v303_v32 = vshrl.u32 %v944_v44, %v297_v15  ;;  %v1098_v16 = vld [vmem:[#allocation3 + $0x50] sm:$0xff]  ;;  %v1100_v18 = vld [vmem:[#allocation3 + $0x58] sm:$0xff] }
  0x3f   :  { %v1063_v26 = vmul.u32.u64.low %v1032_v36, %v122_v23  ;;  %v1064_v27 = vmul.u32.u64.high %v1032_v36, %v122_v23, %v1063_v26  ;;  %v1067_v28 = vmul.u32.u64.low %v1032_v36, %v118_v22  ;;  %v1068_v29 = vmul.u32.u64.high %v1032_v36, %v118_v22, %v1067_v28 }
  0x40   :  { %v305_v33 = vshll.u32 %v944_v44, %v296_v1  ;;  %v306_v34 = vshrl.u32 %v945_v46, %v297_v15  ;;  %v308_v39 = vshll.u32 %v945_v46, %v296_v1  ;;  %v309_v41 = vshrl.u32 %v946_v48, %v297_v15 }
  0x41   :  { %v311_v43 = vshll.u32 %v946_v48, %v296_v1  ;;  %v301_v45 = vor.u32 %v300_v30, %v299_v21  ;;  %v304_v36 = vor.u32 %v303_v32, %v302_v31  ;;  %v312_v47 = vshrl.u32 %v947_v55, %v297_v15 }
  0x42   :  { %vm314_vm6 = vcmp.lt.s32.totalorder %v295_v63, 1  ;;  %vm132_vm7 = vc.u32 %v1064_v27, %v1067_v28  ;;  %v133_v49 = vadd.s32 1, %v1068_v29  ;;  %v307_v50 = vor.u32 %v306_v34, %v305_v33  ;;  %v70_v33 = vld [vmem:[#allocation6 + $0x8] sm:$0xff] }
  0x43   :  { %v499_v51 = vadd.s32 1, %v1036_v38  ;;  %v310_v52 = vor.u32 %v309_v41, %v308_v39  ;;  %v313_v53 = vor.u32 %v312_v47, %v311_v43  ;;  %vm315_vm8 = vcmp.lt.s32.totalorder %v295_v63, 2  ;;  %v72_v43 = vld [vmem:[#allocation6 + $0x10] sm:$0xff] }
  0x44   :  { %vm316_vm9 = vcmp.lt.s32.totalorder %v295_v63, 3  ;;  %v134_v54 = vsel %vm132_vm7, %v133_v49, %v1068_v29  ;;  %vm317_vm10 = vcmp.lt.s32.totalorder %v295_v63, 4  ;;  %v318_v56 = vsel %vm314_vm6, %v298_v25, %v301_v45 }
  0x45   :  { %v322_v57 = vsel %vm314_vm6, %v301_v45, %v304_v36  ;;  %v135_v58 = vadd.s32 %v134_v54, %v130_v24  ;;  %v319_v59 = vsel %vm317_vm10, %v307_v50, 2102212464  ;;  %v323_v60 = vsel %vm317_vm10, %v310_v52, 920167782  ;;  %v1108_v24 = vld [vmem:[#allocation3 + $0x48] sm:$0xff] }
  0x46   :  { %v326_v61 = vsel %vm314_vm6, %v304_v36, %v307_v50  ;;  %v320_v62 = vsel %vm316_vm9, %v304_v36, %v319_v59  ;;  %v324_v1 = vsel %vm316_vm9, %v307_v50, %v323_v60  ;;  %v327_v3 = vsel %vm317_vm10, %v313_v53, 1326507024 }
  0x47   :  { %vm500_vm11 = vcmp.gt.s32.totalorder %v499_v51, 0  ;;  %v136_v38 = vadd.s32 536870912, %v135_v58  ;;  %v325_v4 = vsel %vm315_vm8, %v322_v57, %v324_v1  ;;  %v328_v6 = vsel %vm316_vm9, %v310_v52, %v327_v3 }
  0x48   :  { %v496_v8 = vand.u32 8388607, %v489_v35  ;;  %v321_v9 = vsel %vm315_vm8, %v318_v56, %v320_v62  ;;  %v329_v11 = vsel %vm315_vm8, %v326_v61, %v328_v6  ;;  %v501_v23 = vsel %vm500_vm11, %v499_v51, 0 }
  0x49   :  { %v1094_v14 = vmul.u32.u64.low %v1034_v37, %v325_v4  ;;  %v1095_v15 = vmul.u32.u64.high %v1034_v37, %v325_v4, %v1094_v14  ;;  %v1102_v20 = vshrl.u32 %v136_v38, 30  ;;  %v503_v63 = vand.u32 31, %v501_v23 }
  0x4a   :  { %v1105_v21 = vmul.u32.u64.low %v1034_v37, %v329_v11  ;;  %v1106_v22 = vmul.u32.u64.high %v1034_v37, %v329_v11, %v1105_v21  ;;  %v337_v26 = vmul.u32 %v1034_v37, %v321_v9  ;;  %v497_v30 = vor.u32 8388608, %v496_v8 }
  0x4b   :  { %v138_v25 = vshll.u32 %v1102_v20, 30  ;;  %v340_v29 = vadd.s32 1, %v1095_v15  ;;  %v715_v31 = vmul.f32 %v1100_v18, %v1098_v16  ;;  %v720_v34 = vmul.f32 %v1100_v18, %v1108_v24 }
  0x4c   :  { %vm339_vm12 = vc.u32 %v1106_v22, %v1094_v14  ;;  %v504_v41 = vsub.s32 32, %v503_v63  ;;  %v1123_v36 = vshll.u32 %v497_v30, 8  ;;  %v717_v49 = vmul.f32 5.0, %v70_v33 }
  0x4d   :  { %v1115_v32 = vsub.s32 %v135_v58, %v138_v25  ;;  %v341_v39 = vsel %vm339_vm12, %v340_v29, %v1095_v15  ;;  %v716_v47 = vmul.f32 -0.2, %v715_v31  ;;  %v131_v50 = vadd.s32 %v1067_v28, %v1064_v27  ;;  %v74_v29 = vld [vmem:[#allocation6 + $0x18] sm:$0xff] }
  0x4e   :  { %v342_v45 = vadd.s32 %v341_v39, %v337_v26  ;;  %v721_v52 = vmul.f32 -0.2, %v720_v34  ;;  %v722_v53 = vmul.f32 5.0, %v72_v43  ;;  %v506_v56 = vshll.u32 %v942_v40, %v503_v63 }
  0x4f   :  { %v141_v37 = vsub.s32 0, %v1115_v32  ;;  %v507_v57 = vshrl.u32 %v943_v42, %v504_v41  ;;  %v509_v58 = vshll.u32 %v943_v42, %v503_v63  ;;  %v510_v60 = vshrl.u32 %v944_v44, %v504_v41 }
  0x50   :  { %v343_v54 = vadd.s32 536870912, %v342_v45  ;;  %v512_v61 = vshll.u32 %v944_v44, %v503_v63  ;;  %v513_v62 = vshrl.u32 %v945_v46, %v504_v41  ;;  %v502_v27 = vshrl.u32 %v501_v23, 5 }
  0x51   :  { %v806_v51 = vmin.u32 %v141_v37, %v1115_v32  ;;  %v515_v28 = vshll.u32 %v945_v46, %v503_v63  ;;  %v516_v3 = vshrl.u32 %v946_v48, %v504_v41  ;;  %v161_v4 = vsub.s32 4, %v1102_v20 }
  0x52   :  { %v1134_v1 = vshrl.u32 %v343_v54, 30  ;;  %v718_v6 = vadd.f32 %v717_v49, %v716_v47  ;;  %v723_v8 = vadd.f32 %v722_v53, %v721_v52  ;;  %v505_v44 = vshrl.u32 %v942_v40, %v504_v41 }
  0x53   :  { %v143_v59 = vclz %v806_v51  ;;  %v518_v9 = vshll.u32 %v946_v48, %v503_v63  ;;  %v519_v11 = vshrl.u32 %v947_v55, %v504_v41  ;;  %v508_v15 = vor.u32 %v507_v57, %v506_v56 }
  0x54   :  { %v345_v42 = vshll.u32 %v1134_v1, 30  ;;  %v511_v46 = vor.u32 %v510_v60, %v509_v58  ;;  %v514_v21 = vor.u32 %v513_v62, %v512_v61  ;;  %v517_v26 = vor.u32 %v516_v3, %v515_v28 }
  0x55   :  { %v807_v38 = vadd.s32 4294967294, %v143_v59  ;;  %vm524_vm15 = vcmp.lt.s32.totalorder %v502_v27, 4  ;;  %v520_v63 = vor.u32 %v519_v11, %v518_v9  ;;  %vm521_vm0 = vcmp.lt.s32.totalorder %v502_v27, 1 }
  0x56   :  { %v1144_v25 = vsub.s32 %v342_v45, %v345_v42  ;;  %v526_v40 = vsel %vm524_vm15, %v514_v21, 2102212464  ;;  %v725_v55 = vmul.f32 %v1098_v16, %v1108_v24  ;;  %vm523_vm1 = vcmp.lt.s32.totalorder %v502_v27, 3 }
  0x57   :  { %vm808_vm14 = vcmp.lt.s32.totalorder %v807_v38, 0  ;;  %v727_v41 = vmul.f32 5.0, %v74_v29  ;;  %vm522_vm2 = vcmp.lt.s32.totalorder %v502_v27, 2  ;;  %v525_v37 = vsel %vm521_vm0, %v505_v44, %v508_v15 }
  0x58   :  { %v146_v23 = vsel %vm808_vm14, 0, %v807_v38  ;;  %v348_v48 = vsub.s32 0, %v1144_v25  ;;  %vm1156_vm3 = vcmp.le.f32.partialorder %v75_v13, 0.7853982  ;;  %v530_v51 = vsel %vm524_vm15, %v517_v26, 920167782 }
  0x59   :  { %v147_v30 = vsub.s32 32, %v146_v23  ;;  %v148_v31 = vshll.u32 %v1115_v32, %v146_v23  ;;  %v151_v33 = vsub.s32 4294967266, %v146_v23  ;;  %v527_v32 = vsel %vm523_vm1, %v511_v46, %v526_v40 }
  0x5a   :  { %v814_v43 = vmin.u32 %v348_v48, %v1144_v25  ;;  %v531_v53 = vsel %vm523_vm1, %v514_v21, %v530_v51  ;;  %v533_v54 = vsel %vm521_vm0, %v511_v46, %v514_v21  ;;  %v534_v56 = vsel %vm524_vm15, %v520_v63, 1326507024 }
  0x5b   :  { %v149_v34 = vshrl.u32 %v131_v50, %v147_v30  ;;  %v152_v39 = vadd.s32 127, %v151_v33  ;;  %v529_v50 = vsel %vm521_vm0, %v508_v15, %v511_v46  ;;  %v162_v13 = vsel %vm77_vm13, %v161_v4, %v1102_v20 }
  0x5c   :  { %v350_v52 = vclz %v814_v43  ;;  %v528_v59 = vsel %vm522_vm2, %v525_v37, %v527_v32  ;;  %v338_v60 = vadd.s32 %v1094_v14, %v1106_v22  ;;  %v532_v62 = vsel %vm522_vm2, %v529_v50, %v531_v53 }
  0x5d   :  { %v150_v47 = vor.u32 %v149_v34, %v148_v31  ;;  %v153_v49 = vshll.u32 %v152_v39, 23  ;;  %v535_v28 = vsel %vm523_vm1, %v517_v26, %v534_v56  ;;  %v544_v14 = vmul.u32 %v1123_v36, %v528_v59 }
  0x5e   :  { %v815_v61 = vadd.s32 4294967294, %v350_v52  ;;  %v536_v38 = vsel %vm522_vm2, %v533_v54, %v535_v28  ;;  %v1175_v42 = vmul.u32.u64.low %v1123_v36, %v532_v62  ;;  %v1176_v44 = vmul.u32.u64.high %v1123_v36, %v532_v62, %v1175_v42 }
  0x5f   :  { %v154_v57 = vor.u32 4788187, %v153_v49  ;;  %v157_v58 = vcvt.s32.f32 %v150_v47  ;;  %v1180_v20 = vmul.u32.u64.low %v1123_v36, %v536_v38  ;;  %v1181_v4 = vmul.u32.u64.high %v1123_v36, %v536_v38, %v1180_v20 }
  0x60   :  { %vm816_vm4 = vcmp.lt.s32.totalorder %v815_v61, 0  ;;  %v719_v11 = vmul.f32 2.0, %v718_v6  ;;  %v724_v15 = vmul.f32 10.0, %v723_v8  ;;  %v726_v23 = vmul.f32 0.4, %v725_v55 }
  0x61   :  { %v155_v3 = vand.u32 2147483647, %v154_v57  ;;  %v353_v9 = vsel %vm816_vm4, 0, %v815_v61  ;;  %v547_v29 = vadd.s32 1, %v1176_v44  ;;  %v164_v33 = vsel %vm1156_vm3, 0, %v162_v13 }
  0x62   :  { %v354_v46 = vsub.s32 32, %v353_v9  ;;  %v355_v27 = vshll.u32 %v1144_v25, %v353_v9  ;;  %v358_v21 = vsub.s32 4294967266, %v353_v9  ;;  %v775_v30 = vmul.f32 %v1002_v0, %v719_v11 }
  0x63   :  { %v158_v22 = vmul.f32 %v157_v58, %v155_v3  ;;  %v779_v31 = vmul.f32 %v1002_v0, %v724_v15  ;;  %vm546_vm5 = vc.u32 %v1181_v4, %v1175_v42  ;;  %v728_v43 = vadd.f32 %v727_v41, %v726_v23 }
  0x64   :  { %v356_v36 = vshrl.u32 %v338_v60, %v354_v46  ;;  %v359_v40 = vadd.s32 127, %v358_v21  ;;  %v548_v8 = vsel %vm546_vm5, %v547_v29, %v1176_v44  ;;  %v776_v25 = vadd.f32 %v775_v30, %v1108_v24 }
  0x65   :  { %v159_v26 = vxor.u32 2147483648, %v158_v22  ;;  %v780_v48 = vadd.f32 %v779_v31, %v1098_v16  ;;  %v549_v39 = vadd.s32 %v548_v8, %v544_v14  ;;  %v271_v49 = vadd.s32 3, %v164_v33 }
  0x66   :  { %v357_v55 = vor.u32 %v356_v36, %v355_v27  ;;  %v360_v34 = vshll.u32 %v359_v40, 23  ;;  %778 = vst [vmem:[#allocation8 + $0x48] sm:$0xff] %v776_v25  ;;  %v729_v50 = vmul.f32 3.3333333, %v728_v43  ;;  %v168_v45 = vand.u32 3, %v164_v33 }
  0x67   :  { %v160_v6 = vsel %vm77_vm13, %v159_v26, %v158_v22  ;;  %782 = vst [vmem:[#allocation8 + $0x50] sm:$0xff] %v780_v48  ;;  %v550_v47 = vadd.s32 536870912, %v549_v39  ;;  %v272_v57 = vand.u32 3, %v271_v49  ;;  %vm284_vm6 = vcmp.lt.s32.totalorder %v1018_v12, 0 }
  0x68   :  { %v163_v63 = vsel %vm1156_vm3, %v1016_v10, %v160_v6  ;;  %v361_v37 = vor.u32 4788187, %v360_v34  ;;  %v364_v32 = vcvt.s32.f32 %v357_v55  ;;  %v783_v53 = vmul.f32 %v1002_v0, %v729_v50 }
  0x69   :  { %852 = vcosq.f32 %v163_v63  ;;  %v1200_v52 = vshrl.u32 %v550_v47, 30  ;;  %vm1208_vm7 = vcmp.le.f32.partialorder %v282_v17, 0.7853982  ;;  %v368_v59 = vsub.s32 4, %v1134_v1 }
  0x6a   :  { %854 = vsinq.f32 %v163_v63  ;;  %v362_v51 = vand.u32 2147483647, %v361_v37  ;;  %v784_v41 = vadd.f32 %v783_v53, %v1100_v18  ;;  %vm170_vm8 = vcmp.eq.s32.totalorder %v168_v45, 0 }
  0x6b   :  { %v552_v56 = vshll.u32 %v1200_v52, 30  ;;  %vm173_vm9 = vcmp.eq.s32.totalorder %v168_v45, 2  ;;  %vm274_vm10 = vcmp.eq.s32.totalorder %v272_v57, 0  ;;  %vm277_vm11 = vcmp.eq.s32.totalorder %v272_v57, 2 }
  0x6c   :  { %v365_v54 = vmul.f32 %v364_v32, %v362_v51  ;;  %786 = vst [vmem:[#allocation8 + $0x58] sm:$0xff] %v784_v41  ;;  %v369_v44 = vsel %vm284_vm6, %v368_v59, %v1134_v1  ;;  %vm169_vm12 = vcmp.lt.s32.totalorder %v168_v45, 2  ;;  %vm273_vm13 = vcmp.lt.s32.totalorder %v272_v57, 2 }
  0x6d   :  { %v553_v60 = vsub.s32 %v549_v39, %v552_v56  ;;  %vm167_vm14 = vweird.f32 %v1016_v10  ;;  %v371_v27 = vsel %vm1208_vm7, 0, %v369_v44  ;;  %v545_v36 = vadd.s32 %v1175_v42, %v1181_v4  ;;  %v68_v4 = vld [vmem:[#allocation6] sm:$0xff] }
  0x6e   :  { %v366_v13 = vxor.u32 2147483648, %v365_v54  ;;  %v375_v30 = vand.u32 3, %v371_v27  ;;  %v478_v55 = vadd.s32 3, %v371_v27  ;;  %vm374_vm3 = vweird.f32 %v1018_v12 }
  0x6f   :  { %v555_v62 = vsub.s32 0, %v553_v60  ;;  %v1239_v41 = vmul.f32 5.0, %v68_v4 }
  0x70   :  { %v367_v61 = vsel %vm284_vm6, %v366_v13, %v365_v54  ;;  %vm380_vm0 = vcmp.eq.s32.totalorder %v375_v30, 2  ;;  %vm377_vm1 = vcmp.eq.s32.totalorder %v375_v30, 0  ;;  %vm376_vm2 = vcmp.lt.s32.totalorder %v375_v30, 2 }
  0x71   :  { %v370_v17 = vsel %vm1208_vm7, %v1018_v12, %v367_v61  ;;  %v822_v20 = vmin.u32 %v555_v62, %v553_v60  ;;  %v479_v45 = vand.u32 3, %v478_v55  ;;  %v575_v13 = vsub.s32 4, %v1200_v52 }
  0x72   :  { %856 = vcosq.f32 %v370_v17  ;;  %vm491_vm6 = vcmp.lt.s32.totalorder %v1023_v19, 0 }
  0x73   :  { %v853_v28 = vpop.eup %852  ;;  %858 = vsinq.f32 %v370_v17  ;;  %v557_v11 = vclz %v822_v20  ;;  %vm481_vm4 = vcmp.eq.s32.totalorder %v479_v45, 0  ;;  %vm484_vm5 = vcmp.eq.s32.totalorder %v479_v45, 2 }
  0x74   :  { %v855_v3 = vpop.eup %854  ;;  %v174_v38 = vxor.u32 2147483648, %v853_v28  ;;  %vm480_vm7 = vcmp.lt.s32.totalorder %v479_v45, 2 }
  0x75   :  { %v171_v14 = vxor.u32 2147483648, %v855_v3  ;;  %v823_v23 = vadd.s32 4294967294, %v557_v11 }
  0x76   :  { %v175_v22 = vsel %vm173_vm9, %v174_v38, %v855_v3  ;;  %v279_v9 = vsel %vm277_vm11, %v174_v38, %v855_v3 }
  0x77   :  { %v172_v15 = vsel %vm170_vm8, %v853_v28, %v171_v14  ;;  %v276_v46 = vsel %vm274_vm10, %v853_v28, %v171_v14  ;;  %vm824_vm15 = vcmp.lt.s32.totalorder %v823_v23, 0  ;;  %vm490_vm8 = vcmp.le.f32.partialorder %v489_v35, 0.7853982 }
  0x78   :  { %v176_v21 = vsel %vm169_vm12, %v172_v15, %v175_v22  ;;  %v280_v1 = vsel %vm273_vm13, %v276_v46, %v279_v9  ;;  %v560_v6 = vsel %vm824_vm15, 0, %v823_v23  ;;  %v576_v28 = vsel %vm491_vm6, %v575_v13, %v1200_v52 }
  0x79   :  { %v1226_v26 = vsel %vm167_vm14, nan, %v176_v21  ;;  %v1228_v29 = vsel %vm167_vm14, nan, %v280_v1  ;;  %v561_v8 = vsub.s32 32, %v560_v6  ;;  %v562_v25 = vshll.u32 %v553_v60, %v560_v6 }
  0x7a   :  { %v734_v31 = vmul.f32 %v1226_v26, %v1098_v16  ;;  %v735_v33 = vmul.f32 %v1228_v29, %v1100_v18  ;;  %v565_v48 = vsub.s32 4294967266, %v560_v6  ;;  %v730_v20 = vmul.f32 %v1228_v29, %v1098_v16 }
  0x7b   :  { %v563_v37 = vshrl.u32 %v545_v36, %v561_v8  ;;  %v731_v14 = vmul.f32 %v1226_v26, %v1100_v18  ;;  %v578_v46 = vsel %vm490_vm8, 0, %v576_v28  ;;  %vm581_vm15 = vweird.f32 %v1023_v19 }
  0x7c   :  { %v736_v40 = vsub.f32 %v734_v31, %v735_v33  ;;  %v857_v63 = vpop.eup %856  ;;  %v566_v32 = vadd.s32 127, %v565_v48  ;;  %v685_v16 = vadd.s32 3, %v578_v46  ;;  %v582_v31 = vand.u32 3, %v578_v46 }
  0x7d   :  { %v859_v39 = vpop.eup %858  ;;  %v381_v43 = vxor.u32 2147483648, %v857_v63  ;;  %v564_v50 = vor.u32 %v563_v37, %v562_v25  ;;  %v732_v52 = vadd.f32 %v731_v14, %v730_v20 }
  0x7e   :  { %v755_v34 = vmul.f32 %v1002_v0, %v736_v40  ;;  %v378_v47 = vxor.u32 2147483648, %v859_v39  ;;  %v567_v51 = vshll.u32 %v566_v32, 23  ;;  %v686_v33 = vand.u32 3, %v685_v16 }
  0x7f   :  { %v382_v49 = vsel %vm380_vm0, %v381_v43, %v859_v39  ;;  %v571_v57 = vcvt.s32.f32 %v564_v50  ;;  %v486_v3 = vsel %vm484_vm5, %v381_v43, %v859_v39  ;;  %vm587_vm9 = vcmp.eq.s32.totalorder %v582_v31, 2 }
  0x80   :  { %v756_v42 = vadd.f32 %v755_v34, %v1018_v12  ;;  %v379_v53 = vsel %vm377_vm1, %v857_v63, %v378_v47  ;;  %v568_v56 = vor.u32 4788187, %v567_v51  ;;  %v483_v17 = vsel %vm481_vm4, %v857_v63, %v378_v47 }
  0x81   :  { %v383_v54 = vsel %vm376_vm2, %v379_v53, %v382_v49  ;;  %v487_v11 = vsel %vm480_vm7, %v483_v17, %v486_v3  ;;  %vm691_vm10 = vcmp.eq.s32.totalorder %v686_v33, 2  ;;  %vm584_vm11 = vcmp.eq.s32.totalorder %v582_v31, 0 }
  0x82   :  { %758 = vst [vmem:[#allocation8 + $0x20] sm:$0xff] %v756_v42  ;;  %v384_v58 = vsel %vm374_vm3, nan, %v383_v54  ;;  %v569_v59 = vand.u32 2147483647, %v568_v56  ;;  %v488_v21 = vsel %vm374_vm3, nan, %v487_v11  ;;  %vm688_vm12 = vcmp.eq.s32.totalorder %v686_v33, 0 }
  0x83   :  { %860 = vrcp.f32 %v384_v58  ;;  %v712_v60 = vmul.f32 %v384_v58, %v1226_v26  ;;  %vm583_vm13 = vcmp.lt.s32.totalorder %v582_v31, 2  ;;  %vm687_vm14 = vcmp.lt.s32.totalorder %v686_v33, 2 }
  0x84   :  { %v572_v61 = vmul.f32 %v571_v57, %v569_v59 }
  0x85   :  { %v713_v62 = vmul.f32 %v712_v60, %v1239_v41 }
  0x86   :  { %v573_v38 = vxor.u32 2147483648, %v572_v61 }
  0x87   :  { %v714_v44 = vsub.f32 -9.81, %v713_v62 }
  0x88   :  { %v574_v22 = vsel %vm491_vm6, %v573_v38, %v572_v61 }
  0x89   :  { %v771_v9 = vmul.f32 %v1002_v0, %v714_v44  ;;  %v577_v15 = vsel %vm490_vm8, %v1023_v19, %v574_v22 }
  0x8a   :  { %862 = vcosq.f32 %v577_v15 }
  0x8b   :  { %v772_v35 = vadd.f32 %v771_v9, %v1010_v7  ;;  %864 = vsinq.f32 %v577_v15 }
  0x8d   :  { %v861_v27 = vpop.eup %860  ;;  %774 = vst [vmem:[#allocation8 + $0x40] sm:$0xff] %v772_v35 }
  0x8e   :  { %v698_v1 = vmul.f32 %v861_v27, %v488_v21  ;;  %v733_v18 = vmul.f32 %v861_v27, %v732_v52 }
  0x90   :  { %v737_v23 = vmul.f32 %v732_v52, %v698_v1  ;;  %v759_v30 = vmul.f32 %v1002_v0, %v733_v18 }
  0x92   :  { %v738_v36 = vadd.f32 %v737_v23, %v1108_v24  ;;  %v760_v40 = vadd.f32 %v759_v30, %v1023_v19 }
  0x94   :  { %v751_v7 = vmul.f32 %v1002_v0, %v738_v36  ;;  %762 = vst [vmem:[#allocation8 + $0x28] sm:$0xff] %v760_v40  ;;  %v863_v6 = vpop.eup %862 }
  0x95   :  { %v865_v12 = vpop.eup %864  ;;  %v588_v25 = vxor.u32 2147483648, %v863_v6 }
  0x96   :  { %v752_v8 = vadd.f32 %v751_v7, %v1016_v10  ;;  %v585_v48 = vxor.u32 2147483648, %v865_v12 }
  0x97   :  { %v589_v24 = vsel %vm587_vm9, %v588_v25, %v865_v12  ;;  %v693_v63 = vsel %vm691_vm10, %v588_v25, %v865_v12 }
  0x98   :  { %754 = vst [vmem:[#allocation8 + $0x18] sm:$0xff] %v752_v8  ;;  %v586_v55 = vsel %vm584_vm11, %v863_v6, %v585_v48  ;;  %v690_v34 = vsel %vm688_vm12, %v863_v6, %v585_v48 }
  0x99   :  { %v590_v39 = vsel %vm583_vm13, %v586_v55, %v589_v24  ;;  %v694_v43 = vsel %vm687_vm14, %v690_v34, %v693_v63 }
  0x9a   :  { %v591_v37 = vsel %vm581_vm15, nan, %v590_v39  ;;  %v695_v32 = vsel %vm581_vm15, nan, %v694_v43 }
  0x9b   :  { %v700_v47 = vmul.f32 %v695_v32, %v1228_v29  ;;  %v701_v10 = vmul.f32 %v591_v37, %v1226_v26  ;;  %v706_v42 = vmul.f32 %v591_v37, %v1228_v29  ;;  %v707_v4 = vmul.f32 %v695_v32, %v1226_v26 }
  0x9d   :  { %v702_v49 = vmul.f32 %v701_v10, %v488_v21  ;;  %v708_v50 = vmul.f32 %v707_v4, %v488_v21 }
  0x9f   :  { %v703_v51 = vadd.f32 %v702_v49, %v700_v47  ;;  %v709_v19 = vsub.f32 %v706_v42, %v708_v50 }
  0xa1   :  { %v704_v53 = vsub.f32 0.0, %v703_v51  ;;  %v710_v45 = vsub.f32 0.0, %v709_v19 }
  0xa3   :  { %v705_v54 = vmul.f32 %v704_v53, %v1239_v41  ;;  %v711_v56 = vmul.f32 %v710_v45, %v1239_v41 }
  0xa5   :  { %v763_v57 = vmul.f32 %v1002_v0, %v705_v54  ;;  %v767_v58 = vmul.f32 %v1002_v0, %v711_v56 }
  0xa7   :  { %v764_v29 = vadd.f32 %v763_v57, %v1004_v2  ;;  %v768_v26 = vadd.f32 %v767_v58, %v1008_v5 }
  0xa9   :  { %766 = vst [vmem:[#allocation8 + $0x30] sm:$0xff] %v764_v29  ;;  %770 = vst [vmem:[#allocation8 + $0x38] sm:$0xff] %v768_v26 }
  0xaa   :  { %921 = shalt.err (!%p918_p6)
}
  0xab   :  { %s922_s15 = scalar_lea.hbm %s1293_s3, 1536 }
  0xac   :  { %p923_p7 = scmp.ne.s32.totalorder %s1293_s3, %s922_s15  ;;  %p926_p8 = scmp.lt.u32.totalorder %s922_s15, %s1293_s3 }
  0xae   :  { %p928_p9 = pnand %p926_p8, %p923_p7 }
  0xb0   :  { %931 = shalt.err (!%p928_p9)
}
  0xb1   :  { %798 = dma.vmem_to_hbm [thread:$0]  %s793_s2, 1536, %s1293_s3, [#allocation5], %s939_s22, %s939_s22, %s940_s23  }
  0xb2   :  { %936 = dma.done.wait [#allocation5], 1536  }
  0xb3   :  { %937 = vsyncadd [#allocation5], 4294965760 }
  0xb4   :  { %802 = vsyncpa [#allocation4], 1 }
  0xb5   :  { %803 = vsyncpa [#allocation7], 1 }
  0xb6   :  { %804 = vsyncpa [#allocation5], 1 }

</bundles_post_ra>
